<compile_context>
chip_gen: v6e
topology: v6e:2x2x1
jax: 0.10.0
libtpu: 0.0.40
codegen_flags: <defaults>
</compile_context>

<pallas_src>
import jax
import jax.numpy as jnp
from jax.experimental import pallas as pl
from jax.experimental.pallas import tpu as pltpu

# Real / padded dimensions (padded output dims are 128-lane aligned).
D_IN = 28 * 28                 # 784 input features (kept un-padded)
D1, D1_P = 350, 384            # fc1 output              350 -> 384
D2, D2_P = 150, 256            # fc2 output              150 -> 256
D3, D3_P = 50, 128             # fc3 output               50 -> 128
N_CLS = 2
D_OUT = 8                      # 4 heads x 2 classes, packed on the lane axis

# Column layout of the fused stage outputs.
C2_D1 = D2                     # stage-2 cols [150,152) = [+d1, -d1] (exit1)
C3_D2 = D3                     # stage-3 cols [ 50, 52) = [+d2, -d2] (exit2)
C3_D1 = D3 + N_CLS             # stage-3 cols [ 52, 54) = [+d1, -d1] carried
# stage-4 (width 8) output     = [d1, -d1, d2, -d2, d3, -d3, d4, -d4]


def policy_kernel(x_ref, w1_ref, b1_ref, w2_ref, b2_ref, w3_ref, b3_ref,
                  w4_ref, b4_ref, out_ref):
    def mm(a_bf16, w_ref, b_ref):
        # bf16 MXU matmul with f32 accumulation and f32 bias-add.
        return (jnp.dot(a_bf16, w_ref[...], preferred_element_type=jnp.float32)
                + b_ref[...])

    def relu_bf16(h_f32):
        # Cast first, ReLU in bf16: numerically identical to relu-then-cast
        # (rounding preserves sign) and halves VALU work on v6e/v7x.
        return jnp.maximum(h_f32.astype(jnp.bfloat16), 0)

    # In-kernel f32 -> bf16 cast; no wrapper-side pad/cast HBM pass.
    x = x_ref[...].astype(jnp.bfloat16)                 # [TB, 784]

    a1 = relu_bf16(mm(x, w1_ref, b1_ref))               # [TB, 384]
    o2 = mm(a1, w2_ref, b2_ref)                         # [TB, 256] cols 150/151 = +/-d1
    a2 = relu_bf16(o2)
    o3 = mm(a2, w3_ref, b3_ref)                         # [TB, 128] cols 50..53 = +/-d2, +/-d1
    a3 = relu_bf16(o3)
    o4 = mm(a3, w4_ref, b4_ref)                         # [TB, 8] = [d1,-d1,d2,-d2,d3,-d3,d4,-d4]

    # Exact per-head 2-class softmax: p0 = sigmoid(d), p1 = sigmoid(-d).
    # Pure VPU/EUP epilogue, no cross-lane slicing, one full-block store.
    out_ref[...] = 1.0 / (1.0 + jnp.exp(-o4))


def _round_up(n, m):
    return ((n + m - 1) // m) * m


def _choose_tb(B):
    """Batch tile: big enough to amortize per-step overhead, grid >= 4 when
    the batch allows it (keeps v7x's second TensorCore busy)."""
    if B <= 512:
        # Single tile; multiple of 16 so bf16 sublane packing is full.
        return _round_up(max(B, 16), 16)
    return min(1024, _round_up(pl.cdiv(B, 4), 256))


def pack_params(params):
    """Pad + fuse per-layer params into 128-aligned bf16 MXU operands.

    Each fused weight packs the main-path layer with the *logit-difference*
    column of the exit head that shares its (relu'd) input, plus its
    negation.  +/-d1 and +/-d2 are forwarded to the final stage with +/-1
    pass-through rows (relu(d) - relu(-d) == d), so the last matmul emits all
    eight head differences directly.  All pad rows/cols are zero.
    """
    f32, bf16 = jnp.float32, jnp.bfloat16

    def wdiff(name):
        w = params[f"w{name}"]
        return w[:, 0] - w[:, 1]

    def bdiff(name):
        b = params[f"b{name}"]
        return b[0, 0] - b[0, 1]

    we1d, be1d = wdiff("e1"), bdiff("e1")
    we2d, be2d = wdiff("e2"), bdiff("e2")
    we3d, be3d = wdiff("e3"), bdiff("e3")
    w4d, b4d = wdiff("4"), bdiff("4")

    w1 = jnp.zeros((D_IN, D1_P), f32).at[:, :D1].set(params["w1"]).astype(bf16)
    b1 = jnp.zeros((1, D1_P), f32).at[:, :D1].set(params["b1"])

    w2 = (jnp.zeros((D1_P, D2_P), f32)
          .at[:D1, :D2].set(params["w2"])
          .at[:D1, C2_D1].set(we1d)
          .at[:D1, C2_D1 + 1].set(-we1d)).astype(bf16)
    b2 = (jnp.zeros((1, D2_P), f32)
          .at[:, :D2].set(params["b2"])
          .at[0, C2_D1].set(be1d)
          .at[0, C2_D1 + 1].set(-be1d))

    w3 = (jnp.zeros((D2_P, D3_P), f32)
          .at[:D2, :D3].set(params["w3"])
          .at[:D2, C3_D2].set(we2d)
          .at[:D2, C3_D2 + 1].set(-we2d)
          # Pass +/-d1 through: relu(d1) - relu(-d1) == d1.
          .at[C2_D1, C3_D1].set(1.0).at[C2_D1 + 1, C3_D1].set(-1.0)
          .at[C2_D1, C3_D1 + 1].set(-1.0).at[C2_D1 + 1, C3_D1 + 1].set(1.0)
          ).astype(bf16)
    b3 = (jnp.zeros((1, D3_P), f32)
          .at[:, :D3].set(params["b3"])
          .at[0, C3_D2].set(be2d)
          .at[0, C3_D2 + 1].set(-be2d))

    w4 = (jnp.zeros((D3_P, D_OUT), f32)
          # exit3 head differences -> out cols 4,5
          .at[:D3, 4].set(we3d).at[:D3, 5].set(-we3d)
          # fc4 head differences   -> out cols 6,7
          .at[:D3, 6].set(w4d).at[:D3, 7].set(-w4d)
          # pass +/-d2 through      -> out cols 2,3
          .at[C3_D2, 2].set(1.0).at[C3_D2 + 1, 2].set(-1.0)
          .at[C3_D2, 3].set(-1.0).at[C3_D2 + 1, 3].set(1.0)
          # pass +/-d1 through      -> out cols 0,1
          .at[C3_D1, 0].set(1.0).at[C3_D1 + 1, 0].set(-1.0)
          .at[C3_D1, 1].set(-1.0).at[C3_D1 + 1, 1].set(1.0)
          ).astype(bf16)
    b4 = (jnp.zeros((1, D_OUT), f32)
          .at[0, 4].set(be3d).at[0, 5].set(-be3d)
          .at[0, 6].set(b4d).at[0, 7].set(-b4d))

    return (w1, b1, w2, b2, w3, b3, w4, b4)


def emnist_policy_net(x_nchw, packed):
    """x_nchw: [B, 1, 28, 28] float32. Returns (y1, y2, y3, y4), each [B, 2]."""
    B = x_nchw.shape[0]
    x = x_nchw.reshape(B, D_IN)             # contiguous reshape: no data movement
    if x.dtype != jnp.float32:
        x = x.astype(jnp.float32)

    TB = _choose_tb(B)
    B_pad = _round_up(B, TB)
    if B_pad != B:                          # batch-only pad; feature dim stays 784
        x = jnp.pad(x, ((0, B_pad - B), (0, 0)))

    w1, b1, w2, b2, w3, b3, w4, b4 = packed

    def resident(a):
        # Full-array block whose index never changes -> stays in VMEM.
        return pl.BlockSpec(a.shape, lambda i: (0, 0))

    weight_bytes = sum(int(a.size) * a.dtype.itemsize for a in packed)
    cost = pl.CostEstimate(
        flops=2 * B_pad * (D_IN * D1_P + D1_P * D2_P + D2_P * D3_P + D3_P * D_OUT),
        transcendentals=B_pad * D_OUT,
        bytes_accessed=B_pad * (D_IN + D_OUT) * 4 + weight_bytes,
    )

    out = pl.pallas_call(
        policy_kernel,
        out_shape=jax.ShapeDtypeStruct((B_pad, D_OUT), jnp.float32),
        grid=(B_pad // TB,),
        in_specs=[
            pl.BlockSpec((TB, D_IN), lambda i: (i, 0)),
            resident(w1), resident(b1),
            resident(w2), resident(b2),
            resident(w3), resident(b3),
            resident(w4), resident(b4),
        ],
        out_specs=pl.BlockSpec((TB, D_OUT), lambda i: (i, 0)),
        compiler_params=pltpu.CompilerParams(
            dimension_semantics=("parallel",),
            vmem_limit_bytes=32 * 1024 * 1024,   # TB=1024 fits v5e's scoped VMEM
        ),
        cost_estimate=cost,
    )(x, w1, b1, w2, b2, w3, b3, w4, b4)

    out = out[:B]
    return (out[:, 0:2], out[:, 2:4], out[:, 4:6], out[:, 6:8])


def init_params(key):
    """Deterministic PyTorch-style init: U(-1/sqrt(fan_in), 1/sqrt(fan_in)).

    Weights are stored already transposed to [in, out]; biases as [1, out].
    """
    dims = {
        "1": (28 * 28, 350),
        "2": (350, 150),
        "3": (150, 50),
        "4": (50, 2),
        "e1": (350, 2),
        "e2": (150, 2),
        "e3": (50, 2),
    }
    params = {}
    keys = jax.random.split(key, 2 * len(dims))
    for i, (name, (fan_in, fan_out)) in enumerate(dims.items()):
        bound = 1.0 / (fan_in ** 0.5)
        wk, bk = keys[2 * i], keys[2 * i + 1]
        params[f"w{name}"] = jax.random.uniform(
            wk, (fan_in, fan_out), jnp.float32, minval=-bound, maxval=bound
        )
        params[f"b{name}"] = jax.random.uniform(
            bk, (1, fan_out), jnp.float32, minval=-bound, maxval=bound
        )
    return params


def reference_forward(x_nchw, params):
    """Pure-JAX f32 reference matching the PyTorch module in eval() mode."""
    x = x_nchw.reshape(x_nchw.shape[0], -1).astype(jnp.float32)

    def lin(a, w, b):
        return a @ params[w] + params[b]

    a1 = jnp.maximum(lin(x, "w1", "b1"), 0.0)
    y1 = jax.nn.softmax(lin(a1, "we1", "be1"), axis=-1)
    a2 = jnp.maximum(lin(a1, "w2", "b2"), 0.0)
    y2 = jax.nn.softmax(lin(a2, "we2", "be2"), axis=-1)
    a3 = jnp.maximum(lin(a2, "w3", "b3"), 0.0)
    y3 = jax.nn.softmax(lin(a3, "we3", "be3"), axis=-1)
    y4 = jax.nn.softmax(lin(a3, "w4", "b4"), axis=-1)
    return (y1, y2, y3, y4)


if __name__ == "__main__":
    key = jax.random.PRNGKey(0)
    pkey, xkey = jax.random.split(key)
    params = init_params(pkey)
    packed = pack_params(params)

    # Module-consistent small input: batch=2, NCHW = [2, 1, 28, 28].
    x = jax.random.normal(xkey, (2, 1, 28, 28), jnp.float32)

    fwd = jax.jit(emnist_policy_net)
    outs = jax.block_until_ready(fwd(x, packed))

    # Sanity: four softmax heads of shape [2, 2], rows sum to ~1, and the
    # bf16-MXU kernel tracks the f32 reference.
    ref = reference_forward(x, params)
    assert len(outs) == 4
    for y, y_ref in zip(outs, ref):
        assert y.shape == (2, 2)
        assert jnp.allclose(jnp.sum(y, axis=-1), 1.0, atol=1e-5)
        assert jnp.allclose(y, y_ref, atol=3e-2)

    print("KERNEL_OK")
</pallas_src>

<mosaic_0001>
module attributes {stable_mosaic.version = 11 : i64} {
  func.func @policy_kernel(%arg0: i32, %arg1: memref<16x784xf32, #tpu.memory_space<vmem>>, %arg2: memref<784x384xbf16, #tpu.memory_space<vmem>>, %arg3: memref<1x384xf32, #tpu.memory_space<vmem>>, %arg4: memref<384x256xbf16, #tpu.memory_space<vmem>>, %arg5: memref<1x256xf32, #tpu.memory_space<vmem>>, %arg6: memref<256x128xbf16, #tpu.memory_space<vmem>>, %arg7: memref<1x128xf32, #tpu.memory_space<vmem>>, %arg8: memref<128x8xbf16, #tpu.memory_space<vmem>>, %arg9: memref<1x8xf32, #tpu.memory_space<vmem>>, %arg10: memref<16x8xf32, #tpu.memory_space<vmem>>) attributes {dimension_semantics = [#tpu.dimension_semantics<parallel>], iteration_bounds = array<i64: 1>, scalar_prefetch = 0 : i64, scratch_operands = 0 : i64, tpu.core_type = #tpu.core_type<tc>, window_params = [{transform_indices = @transform_0, window_bounds = array<i64: 16, 784>}, {pipeline_mode = #tpu.pipeline_mode<synchronous>, transform_indices = @transform_1, window_bounds = array<i64: 784, 384>}, {pipeline_mode = #tpu.pipeline_mode<synchronous>, transform_indices = @transform_2, window_bounds = array<i64: 1, 384>}, {pipeline_mode = #tpu.pipeline_mode<synchronous>, transform_indices = @transform_3, window_bounds = array<i64: 384, 256>}, {pipeline_mode = #tpu.pipeline_mode<synchronous>, transform_indices = @transform_4, window_bounds = array<i64: 1, 256>}, {pipeline_mode = #tpu.pipeline_mode<synchronous>, transform_indices = @transform_5, window_bounds = array<i64: 256, 128>}, {pipeline_mode = #tpu.pipeline_mode<synchronous>, transform_indices = @transform_6, window_bounds = array<i64: 1, 128>}, {pipeline_mode = #tpu.pipeline_mode<synchronous>, transform_indices = @transform_7, window_bounds = array<i64: 128, 8>}, {pipeline_mode = #tpu.pipeline_mode<synchronous>, transform_indices = @transform_8, window_bounds = array<i64: 1, 8>}, {transform_indices = @transform_9, window_bounds = array<i64: 16, 8>}]} {
    %c0 = arith.constant 0 : index
    %c0_0 = arith.constant 0 : index
    %0 = vector.load %arg1[%c0, %c0_0] : memref<16x784xf32, #tpu.memory_space<vmem>>, vector<16x784xf32>
    %1 = arith.truncf %0 : vector<16x784xf32> to vector<16x784xbf16>
    %c0_1 = arith.constant 0 : index
    %c0_2 = arith.constant 0 : index
    %2 = vector.load %arg2[%c0_1, %c0_2] : memref<784x384xbf16, #tpu.memory_space<vmem>>, vector<784x384xbf16>
    %cst = arith.constant dense<0.000000e+00> : vector<16x384xf32>
    %3 = tpu.matmul %1, %2, %cst {dimension_numbers = #tpu.dot_dimension_numbers<[1], [0], [0], [1], [0, 0, 1, 1], [], []>} : vector<16x784xbf16>, vector<784x384xbf16>, vector<16x384xf32> -> vector<16x384xf32>
    %c0_3 = arith.constant 0 : index
    %c0_4 = arith.constant 0 : index
    %4 = vector.load %arg3[%c0_3, %c0_4] : memref<1x384xf32, #tpu.memory_space<vmem>>, vector<1x384xf32>
    %5 = vector.broadcast %4 : vector<1x384xf32> to vector<16x384xf32>
    %6 = arith.addf %3, %5 : vector<16x384xf32>
    %7 = arith.truncf %6 : vector<16x384xf32> to vector<16x384xbf16>
    %cst_5 = arith.constant 0.000000e+00 : bf16
    %8 = vector.broadcast %cst_5 : bf16 to vector<16x384xbf16>
    %9 = arith.maximumf %7, %8 : vector<16x384xbf16>
    %c0_6 = arith.constant 0 : index
    %c0_7 = arith.constant 0 : index
    %10 = vector.load %arg4[%c0_6, %c0_7] : memref<384x256xbf16, #tpu.memory_space<vmem>>, vector<384x256xbf16>
    %cst_8 = arith.constant dense<0.000000e+00> : vector<16x256xf32>
    %11 = tpu.matmul %9, %10, %cst_8 {dimension_numbers = #tpu.dot_dimension_numbers<[1], [0], [0], [1], [0, 0, 1, 1], [], []>} : vector<16x384xbf16>, vector<384x256xbf16>, vector<16x256xf32> -> vector<16x256xf32>
    %c0_9 = arith.constant 0 : index
    %c0_10 = arith.constant 0 : index
    %12 = vector.load %arg5[%c0_9, %c0_10] : memref<1x256xf32, #tpu.memory_space<vmem>>, vector<1x256xf32>
    %13 = vector.broadcast %12 : vector<1x256xf32> to vector<16x256xf32>
    %14 = arith.addf %11, %13 : vector<16x256xf32>
    %15 = arith.truncf %14 : vector<16x256xf32> to vector<16x256xbf16>
    %cst_11 = arith.constant 0.000000e+00 : bf16
    %16 = vector.broadcast %cst_11 : bf16 to vector<16x256xbf16>
    %17 = arith.maximumf %15, %16 : vector<16x256xbf16>
    %c0_12 = arith.constant 0 : index
    %c0_13 = arith.constant 0 : index
    %18 = vector.load %arg6[%c0_12, %c0_13] : memref<256x128xbf16, #tpu.memory_space<vmem>>, vector<256x128xbf16>
    %cst_14 = arith.constant dense<0.000000e+00> : vector<16x128xf32>
    %19 = tpu.matmul %17, %18, %cst_14 {dimension_numbers = #tpu.dot_dimension_numbers<[1], [0], [0], [1], [0, 0, 1, 1], [], []>} : vector<16x256xbf16>, vector<256x128xbf16>, vector<16x128xf32> -> vector<16x128xf32>
    %c0_15 = arith.constant 0 : index
    %c0_16 = arith.constant 0 : index
    %20 = vector.load %arg7[%c0_15, %c0_16] : memref<1x128xf32, #tpu.memory_space<vmem>>, vector<1x128xf32>
    %21 = vector.broadcast %20 : vector<1x128xf32> to vector<16x128xf32>
    %22 = arith.addf %19, %21 : vector<16x128xf32>
    %23 = arith.truncf %22 : vector<16x128xf32> to vector<16x128xbf16>
    %cst_17 = arith.constant 0.000000e+00 : bf16
    %24 = vector.broadcast %cst_17 : bf16 to vector<16x128xbf16>
    %25 = arith.maximumf %23, %24 : vector<16x128xbf16>
    %c0_18 = arith.constant 0 : index
    %c0_19 = arith.constant 0 : index
    %26 = vector.load %arg8[%c0_18, %c0_19] : memref<128x8xbf16, #tpu.memory_space<vmem>>, vector<128x8xbf16>
    %cst_20 = arith.constant dense<0.000000e+00> : vector<16x8xf32>
    %27 = tpu.matmul %25, %26, %cst_20 {dimension_numbers = #tpu.dot_dimension_numbers<[1], [0], [0], [1], [0, 0, 1, 1], [], []>} : vector<16x128xbf16>, vector<128x8xbf16>, vector<16x8xf32> -> vector<16x8xf32>
    %c0_21 = arith.constant 0 : index
    %c0_22 = arith.constant 0 : index
    %28 = vector.load %arg9[%c0_21, %c0_22] : memref<1x8xf32, #tpu.memory_space<vmem>>, vector<1x8xf32>
    %29 = vector.broadcast %28 : vector<1x8xf32> to vector<16x8xf32>
    %30 = arith.addf %27, %29 : vector<16x8xf32>
    %cst_23 = arith.constant 0.000000e+00 : f32
    %31 = vector.broadcast %cst_23 : f32 to vector<16x8xf32>
    %32 = arith.subf %31, %30 : vector<16x8xf32>
    %33 = math.exp %32 : vector<16x8xf32>
    %cst_24 = arith.constant 1.000000e+00 : f32
    %34 = vector.broadcast %cst_24 : f32 to vector<16x8xf32>
    %35 = arith.addf %34, %33 : vector<16x8xf32>
    %cst_25 = arith.constant 1.000000e+00 : f32
    %36 = vector.broadcast %cst_25 : f32 to vector<16x8xf32>
    %37 = arith.divf %36, %35 : vector<16x8xf32>
    %c0_26 = arith.constant 0 : index
    %c0_27 = arith.constant 0 : index
    %38 = vector.load %arg10[%c0_26, %c0_27] : memref<16x8xf32, #tpu.memory_space<vmem>>, vector<16x8xf32>
    tpu.vector_store %arg10[%c0_26, %c0_27], %37 {strides = array<i32>} : memref<16x8xf32, #tpu.memory_space<vmem>>, vector<16x8xf32>,
    return
  }
  func.func @transform_0(%arg0: i32) -> (i32, i32) {
    %c0_i32 = arith.constant 0 : i32
    %c0_i32_0 = arith.constant 0 : i32
    return %arg0, %c0_i32 : i32, i32
  }
  func.func @transform_1(%arg0: i32) -> (i32, i32) {
    %c0_i32 = arith.constant 0 : i32
    %c0_i32_0 = arith.constant 0 : i32
    %c0_i32_1 = arith.constant 0 : i32
    return %c0_i32, %c0_i32_0 : i32, i32
  }
  func.func @transform_2(%arg0: i32) -> (i32, i32) {
    %c0_i32 = arith.constant 0 : i32
    %c0_i32_0 = arith.constant 0 : i32
    %c0_i32_1 = arith.constant 0 : i32
    return %c0_i32, %c0_i32_0 : i32, i32
  }
  func.func @transform_3(%arg0: i32) -> (i32, i32) {
    %c0_i32 = arith.constant 0 : i32
    %c0_i32_0 = arith.constant 0 : i32
    %c0_i32_1 = arith.constant 0 : i32
    return %c0_i32, %c0_i32_0 : i32, i32
  }
  func.func @transform_4(%arg0: i32) -> (i32, i32) {
    %c0_i32 = arith.constant 0 : i32
    %c0_i32_0 = arith.constant 0 : i32
    %c0_i32_1 = arith.constant 0 : i32
    return %c0_i32, %c0_i32_0 : i32, i32
  }
  func.func @transform_5(%arg0: i32) -> (i32, i32) {
    %c0_i32 = arith.constant 0 : i32
    %c0_i32_0 = arith.constant 0 : i32
    %c0_i32_1 = arith.constant 0 : i32
    return %c0_i32, %c0_i32_0 : i32, i32
  }
  func.func @transform_6(%arg0: i32) -> (i32, i32) {
    %c0_i32 = arith.constant 0 : i32
    %c0_i32_0 = arith.constant 0 : i32
    %c0_i32_1 = arith.constant 0 : i32
    return %c0_i32, %c0_i32_0 : i32, i32
  }
  func.func @transform_7(%arg0: i32) -> (i32, i32) {
    %c0_i32 = arith.constant 0 : i32
    %c0_i32_0 = arith.constant 0 : i32
    %c0_i32_1 = arith.constant 0 : i32
    return %c0_i32, %c0_i32_0 : i32, i32
  }
  func.func @transform_8(%arg0: i32) -> (i32, i32) {
    %c0_i32 = arith.constant 0 : i32
    %c0_i32_0 = arith.constant 0 : i32
    %c0_i32_1 = arith.constant 0 : i32
    return %c0_i32, %c0_i32_0 : i32, i32
  }
  func.func @transform_9(%arg0: i32) -> (i32, i32) {
    %c0_i32 = arith.constant 0 : i32
    %c0_i32_0 = arith.constant 0 : i32
    return %arg0, %c0_i32 : i32, i32
  }
}

</mosaic_0001>

<bundles_post_ra>
// kernel: emnist_policy_net.1
= control target key start
LH: loop header
LB: loop body
LE: loop exit
PB: predicated region body
PF: predicated region fallthrough
CT: control target
= control target key end

     0   :  { %14 = vsyncpa [#allocation3], 0  ;;  %s3178_s0 = inlined_call_operand.vmem [shape: f32[16,784], index: 0, kind: input, shape index: {}]   ;;  %s3179_s1 = inlined_call_operand.hbm [shape: bf16[784,384], index: 1, kind: input, shape index: {}]   ;;  %s3180_s2 = inlined_call_operand.vmem [shape: f32[1,384], index: 2, kind: input, shape index: {}]   ;;  %s3181_s3 = inlined_call_operand.vmem [shape: bf16[384,256], index: 3, kind: input, shape index: {}]   ;;  %s3182_s4 = inlined_call_operand.vmem [shape: f32[1,256], index: 4, kind: input, shape index: {}]   ;;  %s3183_s5 = inlined_call_operand.hbm [shape: bf16[256,128], index: 5, kind: input, shape index: {}]   ;;  %s3184_s6 = inlined_call_operand.vmem [shape: f32[1,128], index: 6, kind: input, shape index: {}]   ;;  %s3185_s7 = inlined_call_operand.vmem [shape: bf16[128,8], index: 7, kind: input, shape index: {}]   ;;  %s3186_s8 = inlined_call_operand.vmem [shape: f32[1,8], index: 8, kind: input, shape index: {}]   ;;  %s3187_s9 = inlined_call_operand.vmem [shape: f32[16,8], index: 9, kind: output, shape index: {}]  }
   0x1   :  { %15 = vsyncpa [#allocation5], 0  ;;  %s2827_s30 = smov [#allocation2]  }
   0x2   :  { %s23_s10 = sshll.u32 %s2827_s30, 4  ;;  %s24_s10 = int_to_ptr.vmem [resolvable:$true] %s23_s10 }
   0x3   :  { %s2791_s11 = scalar_lea.vmem %s24_s10, 18816  ;;  %p2796_p1 = scmp.lt.s32.totalorder %s24_s10, %s24_s10 }
   0x4   :  { %p2792_p0 = scmp.ne.s32.totalorder %s24_s10, %s2791_s11  ;;  %p2797_p2 = scmp.lt.s32.totalorder %s2791_s11, %s2791_s11 }
   0x6   :  { %p2798_p3 = por %p2797_p2, %p2796_p1 }
   0x8   :  { %p2799_p4 = pnand %p2798_p3, %p2792_p0 }
   0xa   :  { %2802 = shalt.err (!%p2799_p4)
}
   0xb   :  { %s2828_s12 = smov 192   ;;  %s2829_s13 = smov 12  }
   0xc   :  { %29 = dma.hbm_to_vmem [thread:$0]  %s3179_s1, 18816, %s24_s10, [#allocation3], %s2828_s12, %s2828_s12, %s2829_s13  }
   0xd   :  { %s2830_s16 = smov [#allocation4]  }
   0xe   :  { %s41_s17 = sshll.u32 %s2830_s16, 4  ;;  %s42_s17 = int_to_ptr.vmem [resolvable:$true] %s41_s17 }
   0xf   :  { %s2811_s18 = scalar_lea.vmem %s42_s17, 2048  ;;  %p2816_p6 = scmp.lt.s32.totalorder %s42_s17, %s42_s17 }
  0x10   :  { %p2812_p5 = scmp.ne.s32.totalorder %s42_s17, %s2811_s18  ;;  %p2817_p7 = scmp.lt.s32.totalorder %s2811_s18, %s2811_s18 }
  0x12   :  { %p2818_p8 = por %p2817_p7, %p2816_p6 }
  0x14   :  { %p2819_p9 = pnand %p2818_p8, %p2812_p5 }
  0x16   :  { %2822 = shalt.err (!%p2819_p9)
}
  0x17   :  { %s2831_s19 = smov 64   ;;  %s2832_s20 = smov 4  }
  0x18   :  { %47 = dma.hbm_to_vmem [thread:$0]  %s3183_s5, 2048, %s42_s17, [#allocation5], %s2831_s19, %s2831_s19, %s2832_s20  }
  0x19   :  { %2823 = dma.done.wait [#allocation3], 18816  }
  0x1a   :  { %2824 = vsyncadd [#allocation3], 4294948480 }
  0x1b   :  { %2825 = dma.done.wait [#allocation5], 2048  }
  0x1c   :  { %2826 = vsyncadd [#allocation5], 4294965248  ;;  %v2483_v0 = vld [vmem:[#allocation2 + $0xac] ss:$12 sps:$4 sm:$0xff]   ;;  %v2485_v1 = vld [vmem:[#allocation2 + $0xa8] ss:$12 sps:$4 sm:$0xff]  }
  0x1d   :  { %1083 = vmatprep.subr.bf16.mxu0 %v2483_v0  ;;  %v2486_v2 = vld [vmem:[#allocation2 + $0x22c] ss:$12 sps:$4 sm:$0xff]   ;;  %v2488_v3 = vld [vmem:[#allocation2 + $0x228] ss:$12 sps:$4 sm:$0xff]   ;;  %v2491_v5 = vld [vmem:[#allocation2 + $0x90] ss:$12 sps:$4 sm:$0xff]  }
  0x1e   :  { %1084 = vmatpush1.bf16.msra.mxu0 %v2485_v1  ;;  %v2489_v4 = vld [vmem:[#allocation2 + $0x94] ss:$12 sps:$4 sm:$0xff]   ;;  %1126 = vmatprep.subr.bf16.mxu1 %v2486_v2  ;;  %v2494_v7 = vld [vmem:[#allocation2 + $0x210] ss:$12 sps:$4 sm:$0xff]   ;;  %v2497_v9 = vld [vmem:[#allocation2 + $0x78] ss:$12 sps:$4 sm:$0xff]  }
  0x1f   :  { %v2492_v6 = vld [vmem:[#allocation2 + $0x214] ss:$12 sps:$4 sm:$0xff]   ;;  %1127 = vmatpush1.bf16.msra.mxu1 %v2488_v3  ;;  %1085 = vmatprep.subr.bf16.mxu0 %v2489_v4  ;;  %v2495_v8 = vld [vmem:[#allocation2 + $0x7c] ss:$12 sps:$4 sm:$0xff]   ;;  %v2501_v11 = vld [vmem:[#allocation2 + $0x64] ss:$12 sps:$4 sm:$0xff]  }
  0x20   :  { %1128 = vmatprep.subr.bf16.mxu1 %v2492_v6  ;;  %v2498_v10 = vld [vmem:[#allocation2 + $0x1fc] ss:$12 sps:$4 sm:$0xff]   ;;  %v2500_v12 = vld [vmem:[#allocation2 + $0x1f8] ss:$12 sps:$4 sm:$0xff]   ;;  %v2503_v14 = vld [vmem:[#allocation2 + $0x60] ss:$12 sps:$4 sm:$0xff]  }
  0x21   :  { %v2504_v13 = vld [vmem:[#allocation2 + $0x1e4] ss:$12 sps:$4 sm:$0xff]   ;;  %v2507_v15 = vld [vmem:[#allocation2 + $0x4c] ss:$12 sps:$4 sm:$0xff]   ;;  %v2509_v18 = vld [vmem:[#allocation2 + $0x48] ss:$12 sps:$4 sm:$0xff]  }
  0x22   :  { %1086 = vmatpush1.bf16.msra.mxu0 %v2491_v5  ;;  %v2506_v16 = vld [vmem:[#allocation2 + $0x1e0] ss:$12 sps:$4 sm:$0xff]   ;;  %v2512_v20 = vld [vmem:[#allocation2 + $0x1c8] ss:$12 sps:$4 sm:$0xff]   ;;  %v2515_v22 = vld [vmem:[#allocation2 + $0x30] ss:$12 sps:$4 sm:$0xff]  }
  0x23   :  { %1087 = vmatprep.subr.bf16.mxu0 %v2495_v8  ;;  %1129 = vmatpush1.bf16.msra.mxu1 %v2494_v7  ;;  %v2510_v17 = vld [vmem:[#allocation2 + $0x1cc] ss:$12 sps:$4 sm:$0xff]   ;;  %v2513_v19 = vld [vmem:[#allocation2 + $0x34] ss:$12 sps:$4 sm:$0xff]   ;;  %v2519_v23 = vld [vmem:[#allocation2 + $0x1c] ss:$12 sps:$4 sm:$0xff]  }
  0x24   :  { %1130 = vmatprep.subr.bf16.mxu1 %v2498_v10  ;;  %v2516_v21 = vld [vmem:[#allocation2 + $0x1b4] ss:$12 sps:$4 sm:$0xff]   ;;  %v2518_v24 = vld [vmem:[#allocation2 + $0x1b0] ss:$12 sps:$4 sm:$0xff]   ;;  %v2521_v26 = vld [vmem:[#allocation2 + $0x18] ss:$12 sps:$4 sm:$0xff]  }
  0x25   :  { %v2522_v25 = vld [vmem:[#allocation2 + $0x19c] ss:$12 sps:$4 sm:$0xff]   ;;  %v2525_v27 = vld [vmem:[#allocation2 + $0x4] ss:$12 sps:$4 sm:$0xff]   ;;  %v2527_v30 = vld [vmem:[#allocation2] ss:$12 sps:$4 sm:$0xff]  }
  0x26   :  { %1088 = vmatpush1.bf16.msra.mxu0 %v2497_v9  ;;  %v2524_v28 = vld [vmem:[#allocation2 + $0x198] ss:$12 sps:$4 sm:$0xff]   ;;  %v2530_v32 = vld [vmem:[#allocation2 + $0x180] ss:$12 sps:$4 sm:$0xff]   ;;  %v2533_v34 = vld [vmem:[#allocation2 + $0x168] ss:$12 sps:$4 sm:$0xff]  }
  0x27   :  { %1089 = vmatprep.subr.bf16.mxu0 %v2501_v11  ;;  %1131 = vmatpush1.bf16.msra.mxu1 %v2500_v12  ;;  %v2528_v29 = vld [vmem:[#allocation2 + $0x184] ss:$12 sps:$4 sm:$0xff]   ;;  %v2531_v31 = vld [vmem:[#allocation2 + $0x16c] ss:$12 sps:$4 sm:$0xff]   ;;  %v2537_v35 = vld [vmem:[#allocation2 + $0x154] ss:$12 sps:$4 sm:$0xff]  }
  0x28   :  { %1132 = vmatprep.subr.bf16.mxu1 %v2504_v13  ;;  %v2534_v33 = vld [vmem:[#allocation2 + $0x2ec] ss:$12 sps:$4 sm:$0xff]   ;;  %v2536_v36 = vld [vmem:[#allocation2 + $0x2e8] ss:$12 sps:$4 sm:$0xff]   ;;  %v2539_v38 = vld [vmem:[#allocation2 + $0x150] ss:$12 sps:$4 sm:$0xff]  }
  0x29   :  { %v2540_v37 = vld [vmem:[#allocation2 + $0x2d4] ss:$12 sps:$4 sm:$0xff]   ;;  %v2543_v39 = vld [vmem:[#allocation2 + $0x13c] ss:$12 sps:$4 sm:$0xff]   ;;  %v2545_v42 = vld [vmem:[#allocation2 + $0x138] ss:$12 sps:$4 sm:$0xff]  }
  0x2a   :  { %1090 = vmatpush1.bf16.msra.mxu0 %v2503_v14  ;;  %v2542_v40 = vld [vmem:[#allocation2 + $0x2d0] ss:$12 sps:$4 sm:$0xff]   ;;  %v2548_v44 = vld [vmem:[#allocation2 + $0x2b8] ss:$12 sps:$4 sm:$0xff]   ;;  %v62_v46 = vld [vmem:[%s3178_s0 + $0x8] sm:$0xff]  ;;  %vm2835_vm0 = vmmov 0  }
  0x2b   :  { %1091 = vmatprep.subr.bf16.mxu0 %v2507_v15  ;;  %1133 = vmatpush1.bf16.msra.mxu1 %v2506_v16  ;;  %v2546_v41 = vld [vmem:[#allocation2 + $0x2bc] ss:$12 sps:$4 sm:$0xff]   ;;  %v2549_v43 = vld [vmem:[#allocation2 + $0x124] ss:$12 sps:$4 sm:$0xff]   ;;  %v2551_v48 = vld [vmem:[#allocation2 + $0x120] ss:$12 sps:$4 sm:$0xff]  }
  0x2c   :  { %1134 = vmatprep.subr.bf16.mxu1 %v2510_v17  ;;  %v2552_v45 = vld [vmem:[#allocation2 + $0x2a4] ss:$12 sps:$4 sm:$0xff]   ;;  %v2555_v50 = vld [vmem:[#allocation2 + $0x10c] ss:$12 sps:$4 sm:$0xff]   ;;  %v2557_v56 = vld [vmem:[#allocation2 + $0x108] ss:$12 sps:$4 sm:$0xff]  }
  0x2d   :  { %v69_v47 = vld [vmem:[%s3178_s0 + $0x40] sm:$0xff]  ;;  %v64_v52 = vld [vmem:[%s3178_s0 + $0x18] sm:$0xff]  ;;  %v71_v53 = vld [vmem:[%s3178_s0 + $0x50] sm:$0xff]  ;;  %vm1079_vm1 = vcmask 130048   ;;  %vm2117_vm2 = vcmask 64512  }
  0x2e   :  { %1092 = vmatpush1.bf16.msra.mxu0 %v2509_v18  ;;  %v2898_v49 = vpack.c.bf16 %v69_v47, %v62_v46  ;;  %v2554_v51 = vld [vmem:[#allocation2 + $0x2a0] ss:$12 sps:$4 sm:$0xff]   ;;  %v2907_v55 = vpack.c.bf16 %v71_v53, %v64_v52  ;;  %v2560_v58 = vld [vmem:[#allocation2 + $0x288] ss:$12 sps:$4 sm:$0xff]   ;;  %v2563_v60 = vld [vmem:[#allocation2 + $0xf0] ss:$12 sps:$4 sm:$0xff]  }
  0x2f   :  { %1093 = vmatprep.subr.bf16.mxu0 %v2513_v19  ;;  %1135 = vmatpush1.bf16.msra.mxu1 %v2512_v20  ;;  %v2558_v54 = vld [vmem:[#allocation2 + $0x28c] ss:$12 sps:$4 sm:$0xff]   ;;  %v2561_v57 = vld [vmem:[#allocation2 + $0xf4] ss:$12 sps:$4 sm:$0xff]   ;;  %v2567_v61 = vld [vmem:[#allocation2 + $0xdc] ss:$12 sps:$4 sm:$0xff]  }
  0x30   :  { %1136 = vmatprep.subr.bf16.mxu1 %v2516_v21  ;;  %1115 = vmatprep.mubr.bf16.mxu0 %v2898_v49  ;;  %v2564_v59 = vld [vmem:[#allocation2 + $0x274] ss:$12 sps:$4 sm:$0xff]   ;;  %v2566_v62 = vld [vmem:[#allocation2 + $0x270] ss:$12 sps:$4 sm:$0xff]   ;;  %v2569_v0 = vld [vmem:[#allocation2 + $0xd8] ss:$12 sps:$4 sm:$0xff]  }
  0x31   :  { %1158 = vmatprep.mubr.bf16.mxu1 %v2907_v55  ;;  %v2570_v63 = vld [vmem:[#allocation2 + $0x25c] ss:$12 sps:$4 sm:$0xff]   ;;  %v2572_v1 = vld [vmem:[#allocation2 + $0x258] ss:$12 sps:$4 sm:$0xff]   ;;  %v2575_v3 = vld [vmem:[#allocation2 + $0xc0] ss:$12 sps:$4 sm:$0xff]  }
  0x32   :  { %1094 = vmatpush1.bf16.msra.mxu0 %v2515_v22  ;;  %v2573_v2 = vld [vmem:[#allocation2 + $0xc4] ss:$12 sps:$4 sm:$0xff]   ;;  %v2578_v6 = vld [vmem:[#allocation2 + $0x240] ss:$12 sps:$4 sm:$0xff]   ;;  %v68_v7 = vld [vmem:[%s3178_s0 + $0x38] sm:$0xff] }
  0x33   :  { %1095 = vmatprep.subr.bf16.mxu0 %v2519_v23  ;;  %1137 = vmatpush1.bf16.msra.mxu1 %v2518_v24  ;;  %v2576_v4 = vld [vmem:[#allocation2 + $0x244] ss:$12 sps:$4 sm:$0xff]   ;;  %v2581_v8 = vld [vmem:[#allocation2 + $0x3ac] ss:$12 sps:$4 sm:$0xff]   ;;  %v2579_v13 = vld [vmem:[#allocation2 + $0x3a8] ss:$12 sps:$4 sm:$0xff]  }
  0x34   :  { %1138 = vmatprep.subr.bf16.mxu1 %v2522_v25  ;;  %v61_v5 = vld [vmem:[%s3178_s0] sm:$0xff]  ;;  %v63_v9 = vld [vmem:[%s3178_s0 + $0x10] sm:$0xff]  ;;  %v70_v10 = vld [vmem:[%s3178_s0 + $0x48] sm:$0xff] }
  0x35   :  { %v2922_v11 = vpack.c.bf16 %v68_v7, %v61_v5  ;;  %v2582_v12 = vld [vmem:[#allocation2 + $0x170] ss:$12 sps:$4 sm:$0xff]   ;;  %v2924_v14 = vpack.c.bf16 %v70_v10, %v63_v9  ;;  %v2586_v15 = vld [vmem:[#allocation2 + $0x394] ss:$12 sps:$4 sm:$0xff]   ;;  %v2587_v17 = vld [vmem:[#allocation2 + $0x158] ss:$12 sps:$4 sm:$0xff]  }
  0x36   :  { %1096 = vmatpush1.bf16.msra.mxu0 %v2521_v26  ;;  %v2583_v16 = vld [vmem:[#allocation2 + $0xb0] ss:$12 sps:$4 sm:$0xff]   ;;  %v2588_v20 = vld [vmem:[#allocation2 + $0x98] ss:$12 sps:$4 sm:$0xff]   ;;  %v2592_v21 = vld [vmem:[#allocation2 + $0x140] ss:$12 sps:$4 sm:$0xff]  }
  0x37   :  { %1097 = vmatprep.subr.bf16.mxu0 %v2525_v27  ;;  %1139 = vmatpush1.bf16.msra.mxu1 %v2524_v28  ;;  %v2584_v18 = vld [vmem:[#allocation2 + $0x390] ss:$12 sps:$4 sm:$0xff]   ;;  %v2589_v22 = vld [vmem:[#allocation2 + $0x378] ss:$12 sps:$4 sm:$0xff]   ;;  %v2593_v24 = vld [vmem:[#allocation2 + $0x80] ss:$12 sps:$4 sm:$0xff]  }
  0x38   :  { %1140 = vmatprep.subr.bf16.mxu1 %v2528_v29  ;;  %v2591_v19 = vld [vmem:[#allocation2 + $0x37c] ss:$12 sps:$4 sm:$0xff]   ;;  %v2596_v23 = vld [vmem:[#allocation2 + $0x364] ss:$12 sps:$4 sm:$0xff]   ;;  %v2594_v26 = vld [vmem:[#allocation2 + $0x360] ss:$12 sps:$4 sm:$0xff]  }
  0x39   :  { %v2597_v25 = vld [vmem:[#allocation2 + $0x128] ss:$12 sps:$4 sm:$0xff]   ;;  %v2601_v27 = vld [vmem:[#allocation2 + $0x34c] ss:$12 sps:$4 sm:$0xff]   ;;  %v2602_v29 = vld [vmem:[#allocation2 + $0x110] ss:$12 sps:$4 sm:$0xff]  }
  0x3a   :  { %1098 = vmatpush1.bf16.msra.mxu0 %v2527_v30  ;;  %v2598_v28 = vld [vmem:[#allocation2 + $0x68] ss:$12 sps:$4 sm:$0xff]   ;;  %v2623_v47 = vld [vmem:[#allocation2 + $0x230] ss:$12 sps:$4 sm:$0xff]   ;;  %v2647_v5 = vld [vmem:[#allocation2 + $0x278] ss:$12 sps:$4 sm:$0xff]  }
  0x3b   :  { %1099 = vmatprep.subr.bf16.mxu0 %v2531_v31  ;;  %1141 = vmatpush1.bf16.msra.mxu1 %v2530_v32  ;;  %v2599_v30 = vld [vmem:[#allocation2 + $0x348] ss:$12 sps:$4 sm:$0xff]   ;;  %v2603_v32 = vld [vmem:[#allocation2 + $0x50] ss:$12 sps:$4 sm:$0xff]   ;;  %v2652_v9 = vld [vmem:[#allocation2 + $0x260] ss:$12 sps:$4 sm:$0xff]  }
  0x3c   :  { %1142 = vmatprep.subr.bf16.mxu1 %v2534_v33  ;;  %v2606_v31 = vld [vmem:[#allocation2 + $0x334] ss:$12 sps:$4 sm:$0xff]   ;;  %v2607_v33 = vld [vmem:[#allocation2 + $0xf8] ss:$12 sps:$4 sm:$0xff]   ;;  %v2624_v52 = vld [vmem:[#allocation2 + $0x450] ss:$12 sps:$4 sm:$0xff]  }
  0x3d   :  { %v2619_v46 = vld [vmem:[#allocation2 + $0x468] ss:$12 sps:$4 sm:$0xff]   ;;  %v2653_v10 = vld [vmem:[#allocation2 + $0x1a0] ss:$12 sps:$4 sm:$0xff]  }
  0x3e   :  { %1100 = vmatpush2.bf16.msra.mxu0 %v2533_v34  ;;  %v2604_v34 = vld [vmem:[#allocation2 + $0x330] ss:$12 sps:$4 sm:$0xff]  }
  0x3f   :  { %1101 = vmatprep.subr.bf16.mxu0 %v2537_v35  ;;  %1143 = vmatpush2.bf16.msra.mxu1 %v2536_v36  ;;  %v2611_v35 = vld [vmem:[#allocation2 + $0x31c] ss:$12 sps:$4 sm:$0xff]   ;;  %v2608_v36 = vld [vmem:[#allocation2 + $0x38] ss:$12 sps:$4 sm:$0xff]  }
  0x40   :  { %1144 = vmatprep.subr.bf16.mxu1 %v2540_v37  ;;  %v2612_v37 = vld [vmem:[#allocation2 + $0xe0] ss:$12 sps:$4 sm:$0xff]   ;;  %v2651_v7 = vld [vmem:[#allocation2 + $0x3dc] ss:$12 sps:$4 sm:$0xff]  }
  0x42   :  { %1102 = vmatpush2.bf16.msra.mxu0 %v2539_v38  ;;  %v2609_v38 = vld [vmem:[#allocation2 + $0x318] ss:$12 sps:$4 sm:$0xff]  }
  0x43   :  { %1103 = vmatprep.subr.bf16.mxu0 %v2543_v39  ;;  %1145 = vmatpush2.bf16.msra.mxu1 %v2542_v40  ;;  %v2616_v39 = vld [vmem:[#allocation2 + $0x304] ss:$12 sps:$4 sm:$0xff]   ;;  %v2613_v40 = vld [vmem:[#allocation2 + $0x20] ss:$12 sps:$4 sm:$0xff]  }
  0x44   :  { %1146 = vmatprep.subr.bf16.mxu1 %v2546_v41  ;;  %v2617_v41 = vld [vmem:[#allocation2 + $0xc8] ss:$12 sps:$4 sm:$0xff]  }
  0x46   :  { %1104 = vmatpush2.bf16.msra.mxu0 %v2545_v42  ;;  %v2614_v42 = vld [vmem:[#allocation2 + $0x300] ss:$12 sps:$4 sm:$0xff]  }
  0x47   :  { %1105 = vmatprep.subr.bf16.mxu0 %v2549_v43  ;;  %1147 = vmatpush2.bf16.msra.mxu1 %v2548_v44  ;;  %v2621_v43 = vld [vmem:[#allocation2 + $0x46c] ss:$12 sps:$4 sm:$0xff]   ;;  %v2618_v44 = vld [vmem:[#allocation2 + $0x8] ss:$12 sps:$4 sm:$0xff]  }
  0x48   :  { %1148 = vmatprep.subr.bf16.mxu1 %v2552_v45  ;;  %v2622_v45 = vld [vmem:[#allocation2 + $0x2f0] ss:$12 sps:$4 sm:$0xff]  }
  0x4a   :  { %1106 = vmatpush2.bf16.msra.mxu0 %v2551_v48  ;;  %v2626_v48 = vld [vmem:[#allocation2 + $0x454] ss:$12 sps:$4 sm:$0xff]  }
  0x4b   :  { %1107 = vmatprep.subr.bf16.mxu0 %v2555_v50  ;;  %1149 = vmatpush2.bf16.msra.mxu1 %v2554_v51  ;;  %v66_v50 = vld [vmem:[%s3178_s0 + $0x28] sm:$0xff]  ;;  %v73_v51 = vld [vmem:[%s3178_s0 + $0x60] sm:$0xff] }
  0x4c   :  { %1150 = vmatprep.subr.bf16.mxu1 %v2558_v54  ;;  %v2935_v53 = vpack.c.bf16 %v73_v51, %v66_v50  ;;  %v2631_v54 = vld [vmem:[#allocation2 + $0x43c] ss:$12 sps:$4 sm:$0xff]   ;;  %v2675_v51 = vld [vmem:[#allocation2 + $0x320] ss:$12 sps:$4 sm:$0xff]  }
  0x4d   :  { %v2694_v50 = vld [vmem:[%s3181_s3 + $0x20] ss:$8 sps:$4 sm:$0xff]  }
  0x4e   :  { %1108 = vmatpush2.bf16.msra.mxu0 %v2557_v56  ;;  %v2628_v56 = vld [vmem:[#allocation2 + $0x218] ss:$12 sps:$4 sm:$0xff]  }
  0x4f   :  { %1109 = vmatprep.subr.bf16.mxu0 %v2561_v57  ;;  %1151 = vmatpush2.bf16.msra.mxu1 %v2560_v58  ;;  %v2629_v57 = vld [vmem:[#allocation2 + $0x438] ss:$12 sps:$4 sm:$0xff]   ;;  %v2632_v58 = vld [vmem:[#allocation2 + $0x2c0] ss:$12 sps:$4 sm:$0xff]  }
  0x50   :  { %1152 = vmatprep.subr.bf16.mxu1 %v2564_v59  ;;  %v2633_v59 = vld [vmem:[#allocation2 + $0x200] ss:$12 sps:$4 sm:$0xff]  }
  0x52   :  { %1110 = vmatpush2.bf16.msra.mxu0 %v2563_v60  ;;  %v2636_v60 = vld [vmem:[#allocation2 + $0x424] ss:$12 sps:$4 sm:$0xff]  }
  0x53   :  { %1111 = vmatprep.subr.bf16.mxu0 %v2567_v61  ;;  %1153 = vmatpush2.bf16.msra.mxu1 %v2566_v62  ;;  %v2634_v61 = vld [vmem:[#allocation2 + $0x420] ss:$12 sps:$4 sm:$0xff]   ;;  %v2637_v62 = vld [vmem:[#allocation2 + $0x2a8] ss:$12 sps:$4 sm:$0xff]  }
  0x54   :  { %1154 = vmatprep.subr.bf16.mxu1 %v2570_v63  ;;  %v2638_v63 = vld [vmem:[#allocation2 + $0x1e8] ss:$12 sps:$4 sm:$0xff]  }
  0x56   :  { %1112 = vmatpush2.bf16.msra.mxu0 %v2569_v0  ;;  %v2641_v0 = vld [vmem:[#allocation2 + $0x40c] ss:$12 sps:$4 sm:$0xff]  }
  0x57   :  { %1113 = vmatprep.subr.bf16.mxu0 %v2573_v2  ;;  %1155 = vmatpush2.bf16.msra.mxu1 %v2572_v1  ;;  %v2639_v1 = vld [vmem:[#allocation2 + $0x408] ss:$12 sps:$4 sm:$0xff]   ;;  %v2642_v2 = vld [vmem:[#allocation2 + $0x290] ss:$12 sps:$4 sm:$0xff]  }
  0x58   :  { %1156 = vmatprep.subr.bf16.mxu1 %v2576_v4  ;;  %v2644_v4 = vld [vmem:[#allocation2 + $0x3f0] ss:$12 sps:$4 sm:$0xff]  }
  0x5a   :  { %1114 = vmatpush2.bf16.msra.mxu0 %v2575_v3  ;;  %v2643_v3 = vld [vmem:[#allocation2 + $0x1d0] ss:$12 sps:$4 sm:$0xff]  }
  0x5b   :  { %1169 = vmatprep.subr.bf16.mxu0 %v2581_v8  ;;  %1157 = vmatpush2.bf16.msra.mxu1 %v2578_v6  ;;  %v2648_v6 = vld [vmem:[#allocation2 + $0x1b8] ss:$12 sps:$4 sm:$0xff]  }
  0x5c   :  { %2349 = vmatprep.subr.bf16.mxu1 %v2582_v12  ;;  %v2649_v8 = vld [vmem:[#allocation2 + $0x3d8] ss:$12 sps:$4 sm:$0xff]   ;;  %v2657_v12 = vld [vmem:[#allocation2 + $0x248] ss:$12 sps:$4 sm:$0xff]  }
  0x5d   :  { %1116 = vmatmul.mubr.bf16.vlgmr.msra.gmra.mxu0 %v2922_v11 }
  0x5e   :  { %1170 = vmatpush1.bf16.msra.mxu0 %v2579_v13  ;;  %1159 = vmatmul.mubr.bf16.vlgmr.msra.gmra.mxu1 %v2924_v14  ;;  %v2654_v13 = vld [vmem:[#allocation2 + $0x3c0] ss:$12 sps:$4 sm:$0xff]  }
  0x5f   :  { %1171 = vmatprep.subr.bf16.mxu0 %v2586_v15  ;;  %2350 = vmatpush3.bf16.msra.mxu1 %v2583_v16  ;;  %v65_v15 = vld [vmem:[%s3178_s0 + $0x20] sm:$0xff]  ;;  %v72_v16 = vld [vmem:[%s3178_s0 + $0x58] sm:$0xff] }
  0x60   :  { %1287 = vmatprep.mubr.bf16.mxu1 %v2898_v49  ;;  %2351 = vmatprep.subr.bf16.mxu1 %v2587_v17  ;;  %v2627_v49 = vld [vmem:[#allocation2 + $0x2d8] ss:$12 sps:$4 sm:$0xff]  }
  0x61   :  { %1201 = vmatprep.mubr.bf16.mxu0 %v2935_v53  ;;  %v2661_v17 = vld [vmem:[#allocation2 + $0x484] ss:$12 sps:$4 sm:$0xff]  }
  0x62   :  { %1172 = vmatpush1.bf16.msra.mxu0 %v2584_v18  ;;  %v2658_v18 = vld [vmem:[#allocation2 + $0x188] ss:$12 sps:$4 sm:$0xff]  }
  0x63   :  { %1173 = vmatprep.subr.bf16.mxu0 %v2591_v19  ;;  %2352 = vmatpush3.bf16.msra.mxu1 %v2588_v20  ;;  %v2659_v19 = vld [vmem:[#allocation2 + $0x480] ss:$12 sps:$4 sm:$0xff]   ;;  %v2946_v20 = vpack.c.bf16 %v72_v16, %v65_v15  ;;  %v2735_v15 = vld [vmem:[%s3181_s3 + $0x154] ss:$8 sps:$4 sm:$0xff]   ;;  %v2733_v16 = vld [vmem:[%s3181_s3 + $0x150] ss:$8 sps:$4 sm:$0xff]  }
  0x64   :  { %2353 = vmatprep.subr.bf16.mxu1 %v2592_v21  ;;  %v2662_v21 = vld [vmem:[#allocation2 + $0x470] ss:$12 sps:$4 sm:$0xff]  }
  0x66   :  { %1174 = vmatpush1.bf16.msra.mxu0 %v2589_v22  ;;  %v2678_v22 = vld [vmem:[#allocation2 + $0x488] ss:$12 sps:$4 sm:$0xff]  }
  0x67   :  { %1175 = vmatprep.subr.bf16.mxu0 %v2596_v23  ;;  %2354 = vmatpush3.bf16.msra.mxu1 %v2593_v24  ;;  %v67_v23 = vld [vmem:[%s3178_s0 + $0x30] sm:$0xff]  ;;  %v74_v24 = vld [vmem:[%s3178_s0 + $0x68] sm:$0xff] }
  0x68   :  { %2355 = vmatprep.subr.bf16.mxu1 %v2597_v25  ;;  %v2833_v25 = vmov 0.0  }
  0x6a   :  { %1176 = vmatpush1.bf16.msra.mxu0 %v2594_v26  ;;  %v2834_v26 = vmov 0  }
  0x6b   :  { %1177 = vmatprep.subr.bf16.mxu0 %v2601_v27  ;;  %2356 = vmatpush3.bf16.msra.mxu1 %v2598_v28  ;;  %v2663_v27 = vld [vmem:[#allocation2 + $0x3b0] ss:$12 sps:$4 sm:$0xff]   ;;  %v81_v28 = vpack.c.bf16 %v74_v24, %v67_v23 }
  0x6c   :  { %2357 = vmatprep.subr.bf16.mxu1 %v2602_v29  ;;  %v2664_v29 = vld [vmem:[#allocation2 + $0x458] ss:$12 sps:$4 sm:$0xff]   ;;  %v2747_v23 = vld [vmem:[%s3181_s3 + $0x114] ss:$8 sps:$4 sm:$0xff]  }
  0x6d   :  { %v2745_v24 = vld [vmem:[%s3181_s3 + $0x110] ss:$8 sps:$4 sm:$0xff]  }
  0x6e   :  { %1178 = vmatpush1.bf16.msra.mxu0 %v2599_v30  ;;  %v2665_v30 = vld [vmem:[#allocation2 + $0x398] ss:$12 sps:$4 sm:$0xff]  }
  0x6f   :  { %1179 = vmatprep.subr.bf16.mxu0 %v2606_v31  ;;  %2358 = vmatpush3.bf16.msra.mxu1 %v2603_v32  ;;  %v2679_v31 = vld [vmem:[%s3181_s3 + $0x70] ss:$8 sps:$4 sm:$0xff]   ;;  %v2666_v32 = vld [vmem:[#allocation2 + $0x440] ss:$12 sps:$4 sm:$0xff]  }
  0x70   :  { %2359 = vmatprep.subr.bf16.mxu1 %v2607_v33  ;;  %v2684_v33 = vld [vmem:[%s3181_s3 + $0x64] ss:$8 sps:$4 sm:$0xff]  }
  0x72   :  { %1180 = vmatpush1.bf16.msra.mxu0 %v2604_v34  ;;  %v2682_v34 = vld [vmem:[%s3181_s3 + $0x60] ss:$8 sps:$4 sm:$0xff]  }
  0x73   :  { %1181 = vmatprep.subr.bf16.mxu0 %v2611_v35  ;;  %2360 = vmatpush3.bf16.msra.mxu1 %v2608_v36  ;;  %v2667_v35 = vld [vmem:[#allocation2 + $0x380] ss:$12 sps:$4 sm:$0xff]   ;;  %v2687_v36 = vld [vmem:[%s3181_s3 + $0x54] ss:$8 sps:$4 sm:$0xff]  }
  0x74   :  { %2361 = vmatprep.subr.bf16.mxu1 %v2612_v37  ;;  %v2668_v37 = vld [vmem:[#allocation2 + $0x428] ss:$12 sps:$4 sm:$0xff]  }
  0x76   :  { %1182 = vmatpush1.bf16.msra.mxu0 %v2609_v38  ;;  %v2685_v38 = vld [vmem:[%s3181_s3 + $0x50] ss:$8 sps:$4 sm:$0xff]  }
  0x77   :  { %1183 = vmatprep.subr.bf16.mxu0 %v2616_v39  ;;  %2362 = vmatpush3.bf16.msra.mxu1 %v2613_v40  ;;  %v2669_v39 = vld [vmem:[#allocation2 + $0x368] ss:$12 sps:$4 sm:$0xff]   ;;  %v2690_v40 = vld [vmem:[%s3181_s3 + $0x44] ss:$8 sps:$4 sm:$0xff]  }
  0x78   :  { %2363 = vmatprep.subr.bf16.mxu1 %v2617_v41  ;;  %v2670_v41 = vld [vmem:[#allocation2 + $0x410] ss:$12 sps:$4 sm:$0xff]  }
  0x7a   :  { %1184 = vmatpush1.bf16.msra.mxu0 %v2614_v42  ;;  %v2688_v42 = vld [vmem:[%s3181_s3 + $0x40] ss:$8 sps:$4 sm:$0xff]  }
  0x7b   :  { %1185 = vmatprep.subr.bf16.mxu0 %v2621_v43  ;;  %2364 = vmatpush3.bf16.msra.mxu1 %v2618_v44  ;;  %v2671_v43 = vld [vmem:[#allocation2 + $0x350] ss:$12 sps:$4 sm:$0xff]  }
  0x7c   :  { %2371 = vmatprep.subr.bf16.mxu1 %v2622_v45  ;;  %v2693_v44 = vld [vmem:[%s3181_s3 + $0x34] ss:$8 sps:$4 sm:$0xff]   ;;  %v2672_v45 = vld [vmem:[#allocation2 + $0x3f8] ss:$12 sps:$4 sm:$0xff]  }
  0x7e   :  { %1186 = vmatpush2.bf16.msra.mxu0 %v2619_v46  ;;  %1288 = vmatmul.mubr.bf16.vlgmr.msra.gmra.mxu1 %v2922_v11  ;;  %v2656_v11 = vld [vmem:[#allocation2 + $0x3c4] ss:$12 sps:$4 sm:$0xff]  }
  0x7f   :  { %1187 = vmatprep.subr.bf16.mxu0 %v2626_v48  ;;  %2372 = vmatpush3.bf16.msra.mxu1 %v2623_v47  ;;  %v2691_v46 = vld [vmem:[%s3181_s3 + $0x30] ss:$8 sps:$4 sm:$0xff]   ;;  %v2696_v48 = vld [vmem:[%s3181_s3 + $0x24] ss:$8 sps:$4 sm:$0xff]  }
  0x80   :  { %2373 = vmatprep.subr.bf16.mxu1 %v2627_v49  ;;  %1328 = vmatprep.mubr.bf16.mxu1 %v2907_v55  ;;  %v2646_v55 = vld [vmem:[#allocation2 + $0x3f4] ss:$12 sps:$4 sm:$0xff]   ;;  %v2673_v47 = vld [vmem:[#allocation2 + $0x338] ss:$12 sps:$4 sm:$0xff]  }
  0x81   :  { %v2674_v49 = vld [vmem:[#allocation2 + $0x3e0] ss:$12 sps:$4 sm:$0xff]  }
  0x82   :  { %1188 = vmatpush2.bf16.msra.mxu0 %v2624_v52  ;;  %v2699_v52 = vld [vmem:[%s3181_s3 + $0x14] ss:$8 sps:$4 sm:$0xff]  }
  0x83   :  { %1189 = vmatprep.subr.bf16.mxu0 %v2631_v54  ;;  %2374 = vmatpush3.bf16.msra.mxu1 %v2628_v56  ;;  %v2697_v54 = vld [vmem:[%s3181_s3 + $0x10] ss:$8 sps:$4 sm:$0xff]   ;;  %v2677_v56 = vld [vmem:[#allocation2 + $0x308] ss:$12 sps:$4 sm:$0xff]  }
  0x84   :  { %2375 = vmatprep.subr.bf16.mxu1 %v2632_v58  ;;  %v2700_v58 = vld [vmem:[%s3181_s3] ss:$8 sps:$4 sm:$0xff]  }
  0x86   :  { %1190 = vmatpush2.bf16.msra.mxu0 %v2629_v57  ;;  %v2702_v57 = vld [vmem:[%s3181_s3 + $0x4] ss:$8 sps:$4 sm:$0xff]  }
  0x87   :  { %1191 = vmatprep.subr.bf16.mxu0 %v2636_v60  ;;  %2376 = vmatpush3.bf16.msra.mxu1 %v2633_v59  ;;  %v2705_v59 = vld [vmem:[%s3181_s3 + $0xf4] ss:$8 sps:$4 sm:$0xff]   ;;  %v2703_v60 = vld [vmem:[%s3181_s3 + $0xf0] ss:$8 sps:$4 sm:$0xff]  }
  0x88   :  { %2377 = vmatprep.subr.bf16.mxu1 %v2637_v62  ;;  %v2706_v62 = vld [vmem:[%s3181_s3 + $0xe0] ss:$8 sps:$4 sm:$0xff]  }
  0x8a   :  { %1192 = vmatpush2.bf16.msra.mxu0 %v2634_v61  ;;  %v2708_v61 = vld [vmem:[%s3181_s3 + $0xe4] ss:$8 sps:$4 sm:$0xff]  }
  0x8b   :  { %1193 = vmatprep.subr.bf16.mxu0 %v2641_v0  ;;  %2378 = vmatpush3.bf16.msra.mxu1 %v2638_v63  ;;  %v2711_v63 = vld [vmem:[%s3181_s3 + $0xd4] ss:$8 sps:$4 sm:$0xff]   ;;  %v2709_v0 = vld [vmem:[%s3181_s3 + $0xd0] ss:$8 sps:$4 sm:$0xff]  }
  0x8c   :  { %2379 = vmatprep.subr.bf16.mxu1 %v2642_v2  ;;  %v2712_v2 = vld [vmem:[%s3181_s3 + $0xc0] ss:$8 sps:$4 sm:$0xff]  }
  0x8e   :  { %1194 = vmatpush2.bf16.msra.mxu0 %v2639_v1  ;;  %v2714_v1 = vld [vmem:[%s3181_s3 + $0xc4] ss:$8 sps:$4 sm:$0xff]  }
  0x8f   :  { %1195 = vmatprep.subr.bf16.mxu0 %v2646_v55  ;;  %2380 = vmatpush3.bf16.msra.mxu1 %v2643_v3  ;;  %v2717_v3 = vld [vmem:[%s3181_s3 + $0xb4] ss:$8 sps:$4 sm:$0xff]   ;;  %v2715_v55 = vld [vmem:[%s3181_s3 + $0xb0] ss:$8 sps:$4 sm:$0xff]  }
  0x90   :  { %2381 = vmatprep.subr.bf16.mxu1 %v2647_v5  ;;  %v2718_v5 = vld [vmem:[%s3181_s3 + $0xa0] ss:$8 sps:$4 sm:$0xff]  }
  0x92   :  { %1196 = vmatpush2.bf16.msra.mxu0 %v2644_v4  ;;  %v2720_v4 = vld [vmem:[%s3181_s3 + $0xa4] ss:$8 sps:$4 sm:$0xff]  }
  0x93   :  { %1197 = vmatprep.subr.bf16.mxu0 %v2651_v7  ;;  %2382 = vmatpush3.bf16.msra.mxu1 %v2648_v6  ;;  %v2723_v6 = vld [vmem:[%s3181_s3 + $0x94] ss:$8 sps:$4 sm:$0xff]   ;;  %v2721_v7 = vld [vmem:[%s3181_s3 + $0x90] ss:$8 sps:$4 sm:$0xff]  }
  0x94   :  { %2383 = vmatprep.subr.bf16.mxu1 %v2652_v9  ;;  %v2726_v9 = vld [vmem:[%s3181_s3 + $0x84] ss:$8 sps:$4 sm:$0xff]  }
  0x96   :  { %1198 = vmatpush2.bf16.msra.mxu0 %v2649_v8  ;;  %v2724_v8 = vld [vmem:[%s3181_s3 + $0x80] ss:$8 sps:$4 sm:$0xff]  }
  0x97   :  { %1199 = vmatprep.subr.bf16.mxu0 %v2656_v11  ;;  %2384 = vmatpush3.bf16.msra.mxu1 %v2653_v10  ;;  %v2727_v10 = vld [vmem:[%s3181_s3 + $0x170] ss:$8 sps:$4 sm:$0xff]   ;;  %v2729_v11 = vld [vmem:[%s3181_s3 + $0x174] ss:$8 sps:$4 sm:$0xff]  }
  0x98   :  { %2385 = vmatprep.subr.bf16.mxu1 %v2657_v12  ;;  %v2732_v12 = vld [vmem:[%s3181_s3 + $0x164] ss:$8 sps:$4 sm:$0xff]  }
  0x9a   :  { %1200 = vmatpush2.bf16.msra.mxu0 %v2654_v13  ;;  %v2730_v13 = vld [vmem:[%s3181_s3 + $0x160] ss:$8 sps:$4 sm:$0xff]  }
  0x9b   :  { %1226 = vmatprep.subr.bf16.mxu0 %v2661_v17  ;;  %2386 = vmatpush3.bf16.msra.mxu1 %v2658_v18  ;;  %v2738_v17 = vld [vmem:[%s3181_s3 + $0x144] ss:$8 sps:$4 sm:$0xff]   ;;  %v2736_v18 = vld [vmem:[%s3181_s3 + $0x140] ss:$8 sps:$4 sm:$0xff]  }
  0x9c   :  { %2448 = vmatprep.subr.bf16.mxu1 %v2833_v25 }
  0x9d   :  { %1202 = vmatmul.mubr.bf16.vlgmr.msra.gmra.mxu0 %v2946_v20 }
  0x9e   :  { %1227 = vmatpush1.bf16.msra.mxu0 %v2659_v19  ;;  %1244 = vmatprep.mubr.bf16.mxu0 %v2834_v26  ;;  %v2741_v19 = vld [vmem:[%s3181_s3 + $0x134] ss:$8 sps:$4 sm:$0xff]  }
  0x9f   :  { %1329 = vmatmul.mubr.bf16.vlgmr.msra.gmra.mxu1 %v2924_v14  ;;  %2393 = vmatprep.subr.bf16.mxu0 %v2662_v21  ;;  %v2681_v14 = vld [vmem:[%s3181_s3 + $0x74] ss:$8 sps:$4 sm:$0xff]   ;;  %v2744_v21 = vld [vmem:[%s3181_s3 + $0x124] ss:$8 sps:$4 sm:$0xff]  }
  0xa0   :  { %2449 = vmatpush3.bf16.msra.mxu1 %v2678_v22  ;;  %2450 = vmatprep.mubr.msk.bf16.mxu1 %vm2835_vm0, %v2833_v25  ;;  %v2742_v22 = vld [vmem:[%s3181_s3 + $0x120] ss:$8 sps:$4 sm:$0xff]  }
  0xa1   :  { %1725 = vmatprep.subr.bf16.mxu1 %v2681_v14 }
  0xa5   :  { %2273 = vmatmul.mubr.msk.bf16.vlgmr.msra.gmra.mxu0 %vm1079_vm1, %v81_v28 }
  0xa6   :  { %2394 = vmatpush3.bf16.msra.mxu0 %v2663_v27  ;;  %1369 = vmatprep.mubr.bf16.mxu0 %v2935_v53  ;;  %v2676_v53 = vld [vmem:[#allocation2 + $0x3c8] ss:$12 sps:$4 sm:$0xff]   ;;  %v2750_v27 = vld [vmem:[%s3181_s3 + $0x104] ss:$8 sps:$4 sm:$0xff]  }
  0xa7   :  { %2395 = vmatprep.subr.bf16.mxu0 %v2664_v29  ;;  %2451 = vmatmul.mubr.msk.bf16.vlgmr.msra.gmra.mxu1 %vm1079_vm1, %v81_v28  ;;  %v2748_v28 = vld [vmem:[%s3181_s3 + $0x100] ss:$8 sps:$4 sm:$0xff]  }
  0xa8   :  { %1726 = vmatpush1.bf16.msra.mxu1 %v2679_v31 }
  0xa9   :  { %1727 = vmatprep.subr.bf16.mxu1 %v2684_v33 }
  0xaa   :  { %2396 = vmatpush3.bf16.msra.mxu0 %v2665_v30 }
  0xab   :  { %2397 = vmatprep.subr.bf16.mxu0 %v2666_v32 }
  0xac   :  { %1728 = vmatpush1.bf16.msra.mxu1 %v2682_v34  ;;  %v280_v34 = vlaneseq }
  0xad   :  { %1729 = vmatprep.subr.bf16.mxu1 %v2687_v36 }
  0xae   :  { %2398 = vmatpush3.bf16.msra.mxu0 %v2667_v35 }
  0xaf   :  { %2399 = vmatprep.subr.bf16.mxu0 %v2668_v37  ;;  %v3108_v37 = vshrl.u32 %v280_v34, 7 }
  0xb0   :  { %1730 = vmatpush1.bf16.msra.mxu1 %v2685_v38 }
  0xb1   :  { %1731 = vmatprep.subr.bf16.mxu1 %v2690_v40  ;;  %v282_v40 = vsub.s32 0, %v3108_v37 }
  0xb2   :  { %2400 = vmatpush3.bf16.msra.mxu0 %v2669_v39 }
  0xb3   :  { %2401 = vmatprep.subr.bf16.mxu0 %v2670_v41 }
  0xb4   :  { %1732 = vmatpush1.bf16.msra.mxu1 %v2688_v42 }
  0xb5   :  { %1733 = vmatprep.subr.bf16.mxu1 %v2693_v44  ;;  %v286_v44 = vsub.s32 1, %v3108_v37 }
  0xb6   :  { %2402 = vmatpush3.bf16.msra.mxu0 %v2671_v43  ;;  %v278_v43 = vld [vmem:[%s3180_s2] sm:$0x7] }
  0xb7   :  { %2403 = vmatprep.subr.bf16.mxu0 %v2672_v45 }
  0xb8   :  { %1734 = vmatpush1.bf16.msra.mxu1 %v2691_v46  ;;  %v283_v46 = vrot.slane %v278_v43, %v282_v40 }
  0xb9   :  { %1735 = vmatprep.subr.bf16.mxu1 %v2696_v48 }
  0xba   :  { %2404 = vmatpush3.bf16.msra.mxu0 %v2673_v47 }
  0xbb   :  { %2405 = vmatprep.subr.bf16.mxu0 %v2674_v49  ;;  %v287_v49 = vrot.slane %v278_v43, %v286_v44 }
  0xbc   :  { %1736 = vmatpush1.bf16.msra.mxu1 %v2694_v50 }
  0xbd   :  { %1737 = vmatprep.subr.bf16.mxu1 %v2699_v52 }
  0xbe   :  { %2406 = vmatpush3.bf16.msra.mxu0 %v2675_v51 }
  0xbf   :  { %2407 = vmatprep.subr.bf16.mxu0 %v2676_v53 }
  0xc0   :  { %1738 = vmatpush1.bf16.msra.mxu1 %v2697_v54 }
  0xc1   :  { %1739 = vmatprep.subr.bf16.mxu1 %v2702_v57 }
  0xc2   :  { %2408 = vmatpush3.bf16.msra.mxu0 %v2677_v56 }
  0xc3   :  { %1768 = vmatprep.subr.bf16.mxu0 %v2729_v11 }
  0xc4   :  { %1740 = vmatpush1.bf16.msra.mxu1 %v2700_v58 }
  0xc5   :  { %1370 = vmatmul.mubr.bf16.vlgmr.msra.gmra.mxu0 %v2946_v20  ;;  %1741 = vmatprep.subr.bf16.mxu1 %v2705_v59  ;;  %v2739_v20 = vld [vmem:[%s3181_s3 + $0x130] ss:$8 sps:$4 sm:$0xff]  }
  0xc6   :  { %1800 = vmatprep.mubr.bf16.mxu0 %v2834_v26  ;;  %1769 = vmatpush1.bf16.msra.mxu0 %v2727_v10 }
  0xc7   :  { %1770 = vmatprep.subr.bf16.mxu0 %v2732_v12 }
  0xc8   :  { %1742 = vmatpush2.bf16.msra.mxu1 %v2703_v60 }
  0xc9   :  { %1743 = vmatprep.subr.bf16.mxu1 %v2708_v61 }
  0xca   :  { %1771 = vmatpush1.bf16.msra.mxu0 %v2730_v13 }
  0xcb   :  { %1772 = vmatprep.subr.bf16.mxu0 %v2735_v15 }
  0xcc   :  { %1744 = vmatpush2.bf16.msra.mxu1 %v2706_v62 }
  0xcd   :  { %1745 = vmatprep.subr.bf16.mxu1 %v2711_v63 }
  0xce   :  { %1773 = vmatpush1.bf16.msra.mxu0 %v2733_v16 }
  0xcf   :  { %1774 = vmatprep.subr.bf16.mxu0 %v2738_v17 }
  0xd0   :  { %1746 = vmatpush2.bf16.msra.mxu1 %v2709_v0 }
  0xd1   :  { %1747 = vmatprep.subr.bf16.mxu1 %v2714_v1 }
  0xd2   :  { %1775 = vmatpush1.bf16.msra.mxu0 %v2736_v18 }
  0xd3   :  { %1776 = vmatprep.subr.bf16.mxu0 %v2741_v19 }
  0xd4   :  { %1748 = vmatpush2.bf16.msra.mxu1 %v2712_v2 }
  0xd5   :  { %1749 = vmatprep.subr.bf16.mxu1 %v2717_v3 }
  0xd6   :  { %1777 = vmatpush1.bf16.msra.mxu0 %v2739_v20  ;;  %v290_v20 = vsub.s32 2, %v3108_v37  ;;  %v2771_v37 = vld [vmem:[%s3185_s7 + $0x18] sm:$0xff]  }
  0xd7   :  { %1778 = vmatprep.subr.bf16.mxu0 %v2744_v21 }
  0xd8   :  { %1750 = vmatpush2.bf16.msra.mxu1 %v2715_v55  ;;  %v291_v21 = vrot.slane %v278_v43, %v290_v20  ;;  %v2754_v43 = vld [vmem:[#allocation4 + $0x30] sm:$0xff]  }
  0xd9   :  { %1751 = vmatprep.subr.bf16.mxu1 %v2720_v4 }
  0xda   :  { %1779 = vmatpush1.bf16.msra.mxu0 %v2742_v22 }
  0xdb   :  { %1780 = vmatprep.subr.bf16.mxu0 %v2747_v23 }
  0xdc   :  { %1752 = vmatpush2.bf16.msra.mxu1 %v2718_v5 }
  0xdd   :  { %1753 = vmatprep.subr.bf16.mxu1 %v2723_v6 }
  0xde   :  { %1781 = vmatpush1.bf16.msra.mxu0 %v2745_v24 }
  0xdf   :  { %1782 = vmatprep.subr.bf16.mxu0 %v2750_v27 }
  0xe0   :  { %1754 = vmatpush2.bf16.msra.mxu1 %v2721_v7 }
  0xe1   :  { %1755 = vmatprep.subr.bf16.mxu1 %v2726_v9 }
  0xe2   :  { %1783 = vmatpush1.bf16.msra.mxu0 %v2748_v28 }
  0xe4   :  { %1756 = vmatpush2.bf16.msra.mxu1 %v2724_v8 }
  0xe5   :  { %2454 = vmatprep.subr.bf16.mxu1 %v2833_v25 }
 0x11d   :  { %v1117_v32 = vpop.f32.mrf.mxu0 }
 0x11e   :  { %v1160_v29 = vpop.f32.mrf.mxu1  ;;  %v1118_v53 = vadd.f32 %v1117_v32, %v283_v46 }
 0x11f   :  { %v1119_v35 = vpop.f32.mrf.mxu0 }
 0x120   :  { %v1162_v30 = vpop.f32.mrf.mxu1  ;;  %v1120_v57 = vadd.f32 %v1119_v35, %v287_v49  ;;  %v1161_v62 = vadd.f32 %v1160_v29, %v1118_v53  ;;  %v2758_v53 = vld [vmem:[#allocation4 + $0x20] sm:$0xff]  }
 0x121   :  { %v1121_v38 = vpop.f32.mrf.mxu0 }
 0x122   :  { %v1164_v31 = vpop.f32.mrf.mxu1  ;;  %v1122_v52 = vadd.f32 %v1121_v38, %v283_v46  ;;  %v1163_v1 = vadd.f32 %v1162_v30, %v1120_v57  ;;  %v2761_v57 = vld [vmem:[#allocation4 + $0x50] sm:$0xff]  }
 0x123   :  { %v1123_v41 = vpop.f32.mrf.mxu0 }
 0x124   :  { %v1166_v14 = vpop.f32.mrf.mxu1  ;;  %v1124_v58 = vadd.f32 %v1123_v41, %v287_v49  ;;  %v1165_v61 = vadd.f32 %v1164_v31, %v1122_v52  ;;  %v2757_v52 = vld [vmem:[#allocation4 + $0x60] sm:$0xff]  }
 0x126   :  { %v1167_v2 = vadd.f32 %v1166_v14, %v1124_v58  ;;  %v2762_v58 = vld [vmem:[#allocation4 + $0x10] sm:$0xff]  }
 0x13e   :  { %v2365_v33 = vpop.f32.mrf.mxu1 }
 0x140   :  { %v2366_v36 = vpop.f32.mrf.mxu1 }
 0x141   :  { %v2367_v22 = vadd.f32 %v2366_v36, %v2365_v33  ;;  %v2751_v36 = vld [vmem:[#allocation4 + $0x78] sm:$0xff]  }
 0x142   :  { %v2368_v39 = vpop.f32.mrf.mxu1  ;;  %2417 = vmatprep.subr.bf16.mxu0 %v2751_v36 }
 0x143   :  { %v1290_v27 = vadd.f32 %v2367_v22, %v291_v21 }
 0x144   :  { %v2369_v42 = vpop.f32.mrf.mxu1 }
 0x145   :  { %v2370_v23 = vadd.f32 %v2369_v42, %v2368_v39  ;;  %v2752_v39 = vld [vmem:[#allocation4 + $0x38] sm:$0xff]   ;;  %v2753_v42 = vld [vmem:[#allocation4 + $0x70] sm:$0xff]  }
 0x147   :  { %v1293_v30 = vadd.f32 %v2370_v23, %v291_v21 }
 0x15d   :  { %v1203_v45 = vpop.f32.mrf.mxu0 }
 0x15e   :  { %v1204_v55 = vadd.f32 %v1203_v45, %v1161_v62  ;;  %v2766_v62 = vld [vmem:[#allocation4] sm:$0xff]  }
 0x15f   :  { %v1205_v47 = vpop.f32.mrf.mxu0  ;;  %v2387_v48 = vpop.f32.mrf.mxu1 }
 0x160   :  { %v1206_v6 = vadd.f32 %v1205_v47, %v1163_v1  ;;  %v2769_v1 = vld [vmem:[%s3185_s7 + $0x28] sm:$0xff]  }
 0x161   :  { %v1207_v50 = vpop.f32.mrf.mxu0  ;;  %v2388_v51 = vpop.f32.mrf.mxu1 }
 0x162   :  { %v1208_v3 = vadd.f32 %v1207_v50, %v1165_v61  ;;  %v2389_v28 = vadd.f32 %v2388_v51, %v2387_v48  ;;  %v2755_v48 = vld [vmem:[#allocation4 + $0x68] sm:$0xff]   ;;  %v2765_v61 = vld [vmem:[#allocation4 + $0x40] sm:$0xff]  }
 0x163   :  { %v1209_v54 = vpop.f32.mrf.mxu0  ;;  %v2390_v56 = vpop.f32.mrf.mxu1  ;;  %v2756_v51 = vld [vmem:[#allocation4 + $0x28] sm:$0xff]  }
 0x164   :  { %v1210_v7 = vadd.f32 %v1209_v54, %v1167_v2  ;;  %v1331_v34 = vadd.f32 %v2389_v28, %v1290_v27  ;;  %v2759_v54 = vld [vmem:[#allocation4 + $0x58] sm:$0xff]   ;;  %v2770_v2 = vld [vmem:[%s3185_s7 + $0x20] sm:$0xff]   ;;  %v2773_v27 = vld [vmem:[%s3185_s7 + $0x8] sm:$0xff]  }
 0x165   :  { %v1246_v59 = vpop.f32.mrf.mxu0  ;;  %v2391_v60 = vpop.f32.mrf.mxu1  ;;  %v2774_v28 = vld [vmem:[%s3185_s7] sm:$0xff]  }
 0x166   :  { %v1247_v9 = vadd.f32 %v1246_v59, %v1204_v55  ;;  %v2392_v31 = vadd.f32 %v2391_v60, %v2390_v56  ;;  %v2760_v56 = vld [vmem:[#allocation4 + $0x18] sm:$0xff]   ;;  %v2763_v59 = vld [vmem:[#allocation4 + $0x48] sm:$0xff]  }
 0x167   :  { %v1248_v63 = vpop.f32.mrf.mxu0  ;;  %v1412_v0 = vpop.f32.mrf.mxu1  ;;  %v2764_v60 = vld [vmem:[#allocation4 + $0x8] sm:$0xff]  }
 0x168   :  { %v1249_v12 = vadd.f32 %v1248_v63, %v1206_v6  ;;  %v1334_v38 = vadd.f32 %v2392_v31, %v1293_v30  ;;  %v2767_v63 = vld [vmem:[%s3185_s7 + $0x38] sm:$0xff]  }
 0x169   :  { %v1250_v4 = vpop.f32.mrf.mxu0  ;;  %v2452_v5 = vpop.f32.mrf.mxu1 }
 0x16a   :  { %v1251_v8 = vadd.f32 %v1250_v4, %v1208_v3  ;;  %v1473_v4 = vld [vmem:[%s3182_s4] sm:$0x3] }
 0x16b   :  { %v1252_v10 = vpop.f32.mrf.mxu0  ;;  %v1415_v11 = vpop.f32.mrf.mxu1  ;;  %v1478_v6 = vrot.slane %v1473_v4, %v282_v40 }
 0x16c   :  { %v1253_v13 = vadd.f32 %v1252_v10, %v1210_v7  ;;  %v1419_v15 = vpack.c.bf16 %v1251_v8, %v1247_v9  ;;  %v1482_v8 = vrot.slane %v1473_v4, %v286_v44  ;;  %v2772_v44 = vld [vmem:[%s3185_s7 + $0x10] sm:$0xff]  }
 0x16d   :  { %v2453_v16 = vpop.f32.mrf.mxu1 }
 0x16e   :  { %v1420_v17 = vpack.c.bf16 %v1253_v13, %v1249_v12  ;;  %v1422_v19 = vmax.bf16 %v2834_v26, %v1419_v15 }
 0x170   :  { %v1423_v18 = vmax.bf16 %v2834_v26, %v1420_v17 }
 0x172   :  { %1757 = vmatprep.mubr.bf16.mxu1 %v1423_v18 }
 0x173   :  { %1758 = vmatmul.mubr.bf16.vlgmr.msra.gmra.mxu1 %v1422_v19 }
 0x174   :  { %2470 = vmatprep.mubr.msk.bf16.mxu1 %vm2835_vm0, %v2833_v25  ;;  %2455 = vmatpush3.bf16.msra.mxu1 %v2767_v63 }
 0x175   :  { %2456 = vmatprep.subr.bf16.mxu1 %v2833_v25 }
 0x185   :  { %v2409_v24 = vpop.f32.mrf.mxu0 }
 0x187   :  { %v2410_v29 = vpop.f32.mrf.mxu0 }
 0x188   :  { %v2411_v14 = vadd.f32 %v2410_v29, %v2409_v24 }
 0x189   :  { %v2412_v32 = vpop.f32.mrf.mxu0 }
 0x18a   :  { %v1372_v41 = vadd.f32 %v2411_v14, %v1331_v34 }
 0x18b   :  { %v2413_v35 = vpop.f32.mrf.mxu0 }
 0x18c   :  { %v2414_v45 = vadd.f32 %v2413_v35, %v2412_v32  ;;  %v1413_v47 = vadd.f32 %v1412_v0, %v1372_v41  ;;  %v2768_v0 = vld [vmem:[%s3185_s7 + $0x30] sm:$0xff]   ;;  %v2323_v32 = vld [vmem:[%s3184_s6] ss:$0 sm:$0xff] }
 0x18d   :  { %2457 = vmatpush3.bf16.msra.mxu1 %v2768_v0 }
 0x18e   :  { %v1375_v46 = vadd.f32 %v2414_v45, %v1334_v38  ;;  %2458 = vmatprep.subr.bf16.mxu1 %v2833_v25 }
 0x190   :  { %v1416_v49 = vadd.f32 %v1415_v11, %v1375_v46  ;;  %v2340_v46 = vld [vmem:[%s3186_s8] ss:$0 sm:$0xff] }
 0x191   :  { %2459 = vmatpush3.bf16.msra.mxu1 %v2769_v1 }
 0x192   :  { %v1421_v50 = vpack.c.bf16 %v1416_v49, %v1413_v47  ;;  %2460 = vmatprep.subr.bf16.mxu1 %v2833_v25 }
 0x194   :  { %v1424_v33 = vmax.bf16 %v2834_v26, %v1421_v50 }
 0x195   :  { %2461 = vmatpush3.bf16.msra.mxu1 %v2770_v2 }
 0x196   :  { %1801 = vmatmul.mubr.bf16.vlgmr.msra.gmra.mxu0 %v1424_v33  ;;  %2462 = vmatprep.subr.bf16.mxu1 %v2833_v25 }
 0x197   :  { %2418 = vmatpush3.bf16.msra.mxu0 %v2752_v39 }
 0x198   :  { %2419 = vmatprep.subr.bf16.mxu0 %v2753_v42 }
 0x199   :  { %2463 = vmatpush3.bf16.msra.mxu1 %v2771_v37 }
 0x19a   :  { %2464 = vmatprep.subr.bf16.mxu1 %v2833_v25 }
 0x19b   :  { %2420 = vmatpush3.bf16.msra.mxu0 %v2754_v43 }
 0x19c   :  { %2421 = vmatprep.subr.bf16.mxu0 %v2755_v48 }
 0x19d   :  { %2465 = vmatpush3.bf16.msra.mxu1 %v2772_v44 }
 0x19e   :  { %2466 = vmatprep.subr.bf16.mxu1 %v2833_v25 }
 0x19f   :  { %2422 = vmatpush3.bf16.msra.mxu0 %v2756_v51 }
 0x1a0   :  { %2423 = vmatprep.subr.bf16.mxu0 %v2757_v52 }
 0x1a1   :  { %2467 = vmatpush3.bf16.msra.mxu1 %v2773_v27 }
 0x1a2   :  { %2468 = vmatprep.subr.bf16.mxu1 %v2833_v25 }
 0x1a3   :  { %2424 = vmatpush3.bf16.msra.mxu0 %v2758_v53 }
 0x1a4   :  { %2425 = vmatprep.subr.bf16.mxu0 %v2759_v54 }
 0x1a5   :  { %2469 = vmatpush3.bf16.msra.mxu1 %v2774_v28 }
 0x1a7   :  { %2426 = vmatpush3.bf16.msra.mxu0 %v2760_v56 }
 0x1a8   :  { %2427 = vmatprep.subr.bf16.mxu0 %v2761_v57 }
 0x1ab   :  { %2428 = vmatpush3.bf16.msra.mxu0 %v2762_v58 }
 0x1ac   :  { %2429 = vmatprep.subr.bf16.mxu0 %v2763_v59 }
 0x1af   :  { %2430 = vmatpush3.bf16.msra.mxu0 %v2764_v60 }
 0x1b0   :  { %2431 = vmatprep.subr.bf16.mxu0 %v2765_v61 }
 0x1b3   :  { %2432 = vmatpush3.bf16.msra.mxu0 %v2766_v62 }
 0x233   :  { %v1759_v3 = vpop.f32.mrf.mxu1 }
 0x234   :  { %v1760_v12 = vadd.f32 %v1759_v3, %v1478_v6 }
 0x235   :  { %v1761_v55 = vpop.f32.mrf.mxu1 }
 0x236   :  { %v1762_v15 = vadd.f32 %v1761_v55, %v1482_v8 }
 0x237   :  { %v1763_v5 = vpop.f32.mrf.mxu1 }
 0x238   :  { %v1764_v11 = vadd.f32 %v1763_v5, %v1478_v6 }
 0x239   :  { %v1765_v9 = vpop.f32.mrf.mxu1 }
 0x23a   :  { %v1766_v16 = vadd.f32 %v1765_v9, %v1482_v8 }
 0x256   :  { %v1802_v7 = vpop.f32.mrf.mxu0 }
 0x257   :  { %v1803_v18 = vadd.f32 %v1802_v7, %v1760_v12 }
 0x258   :  { %v1804_v10 = vpop.f32.mrf.mxu0 }
 0x259   :  { %v1805_v20 = vadd.f32 %v1804_v10, %v1762_v15 }
 0x25a   :  { %v1806_v13 = vpop.f32.mrf.mxu0 }
 0x25b   :  { %v1807_v17 = vadd.f32 %v1806_v13, %v1764_v11 }
 0x25c   :  { %v1808_v19 = vpop.f32.mrf.mxu0 }
 0x25d   :  { %v1809_v21 = vadd.f32 %v1808_v19, %v1766_v16  ;;  %v1811_v22 = vpack.c.bf16 %v1807_v17, %v1803_v18 }
 0x25f   :  { %v1812_v23 = vpack.c.bf16 %v1809_v21, %v1805_v20  ;;  %v1813_v24 = vmax.bf16 %v2834_v26, %v1811_v22 }
 0x261   :  { %v1814_v40 = vmax.bf16 %v2834_v26, %v1812_v23 }
 0x263   :  { %1982 = vmatprep.mubr.bf16.mxu0 %v1814_v40 }
 0x264   :  { %1983 = vmatmul.mubr.bf16.vlgmr.msra.gmra.mxu0 %v1813_v24 }
 0x324   :  { %v2433_v29 = vpop.f32.mrf.mxu0 }
 0x326   :  { %v2434_v30 = vpop.f32.mrf.mxu0 }
 0x327   :  { %v2435_v14 = vadd.f32 %v2434_v30, %v2433_v29 }
 0x328   :  { %v2436_v31 = vpop.f32.mrf.mxu0 }
 0x329   :  { %v1985_v38 = vadd.f32 %v2435_v14, %v2323_v32 }
 0x32a   :  { %v2437_v34 = vpop.f32.mrf.mxu0 }
 0x32b   :  { %v2438_v35 = vadd.f32 %v2437_v34, %v2436_v31 }
 0x32d   :  { %v1988_v41 = vadd.f32 %v2438_v35, %v2323_v32 }
 0x32f   :  { %v1991_v45 = vpack.c.bf16 %v1988_v41, %v1985_v38 }
 0x331   :  { %v1992_v25 = vmax.bf16 %v2834_v26, %v1991_v45 }
 0x333   :  { %2471 = vmatmul.mubr.bf16.vlgmr.msra.gmra.mxu1 %v1992_v25 }
 0x3f3   :  { %v2098_v47 = vpop.f32.mrf.mxu1 }
 0x3f4   :  { %v2099_v49 = vadd.f32 %v2340_v46, %v2098_v47 }
 0x3f5   :  { %v2472_v50 = vpop.f32.mrf.mxu1 }
 0x3f6   :  { %v2105_v33 = vsub.f32 0.0, %v2099_v49 }
 0x3f7   :  { %v2101_v36 = vpop.f32.mrf.mxu1 }
 0x3f8   :  { %v2107_v39 = vmul.f32 1.442695, %v2105_v33  ;;  %v2102_v42 = vadd.f32 %v2340_v46, %v2101_v36 }
 0x3f9   :  { %v2473_v43 = vpop.f32.mrf.mxu1 }
 0x3fa   :  { %2775 = vpow2.f32 %v2107_v39  ;;  %v2106_v48 = vsub.f32 0.0, %v2102_v42 }
 0x3fc   :  { %v2109_v51 = vmul.f32 1.442695, %v2106_v48 }
 0x3fe   :  { %2777 = vpow2.f32 %v2109_v51 }
 0x407   :  { %v2776_v52 = vpop.eup %2775 }
 0x408   :  { %v2111_v53 = vadd.f32 1.0, %v2776_v52 }
 0x40a   :  { %2779 = vrcp.f32 %v2111_v53 }
 0x40b   :  { %v2778_v26 = vpop.eup %2777 }
 0x40c   :  { %v2112_v54 = vadd.f32 1.0, %v2778_v26 }
 0x40e   :  { %2781 = vrcp.f32 %v2112_v54 }
 0x417   :  { %v2780_v56 = vpop.eup %2779 }
 0x418   :  { %2118 = vst.msk [vmem:[%s3187_s9] sm:$0xff] %vm2117_vm2, %v2780_v56 }
 0x41b   :  { %v2782_v57 = vpop.eup %2781 }
 0x41c   :  { %2119 = vst.msk [vmem:[%s3187_s9 + $0x8] sm:$0xff] %vm2117_vm2, %v2782_v57 }
 0x41d   :  { %2124 = vsyncpa [#allocation3], 1 }
 0x41e   :  { %2125 = vsyncpa [#allocation5], 1 }

</bundles_post_ra>
